<compile_context>
chip_gen: v7x
topology: tpu7x:2x2x1
jax: 0.10.0
libtpu: 0.0.40
codegen_flags: <defaults>
</compile_context>

<pallas_src>
import functools

import jax
import jax.numpy as jnp
from jax import lax
from jax.experimental import pallas as pl
from jax.experimental.pallas import tpu as pltpu

LANES = 128
MAX_TILE_BYTES = 2 * 1024 * 1024   # per-input, per-buffer VMEM tile budget
CHUNK_ROWS = 64                    # fori_loop sub-tile height (bounds live vregs)
NUM_SLICES = 2                     # "parallel" leading grid axis (megacore on v7x)
THRESHOLD = 0.5


def _cdiv(a, b):
    return -(-a // b)


def _round_up(a, b):
    return _cdiv(a, b) * b


def _dice_bce_partials_kernel(o_ref, t_ref, acc_ref, *,
                              tile_rows, chunk_rows, tiles_per_slice,
                              valid_rows, needs_mask):
    """Accumulate per-slice partial sums into the resident output block.

    acc_ref block: (1, 4, 8, LANES) f32, resident across the inner
    ("arbitrary") grid axis.  Channels:
      [0] sum(outputs)                    -> torch.sum(y_true_flat)
      [1] sum(preds_binary)               -> torch.sum(preds_binary)
      [2] sum(outputs * preds_binary)     -> tp
      [3] sum(elementwise BCE)            -> BCELoss numerator
    The tiny cross-lane reduction + dice/BCE combine happens in the wrapper.
    """
    c = pl.program_id(0)
    i = pl.program_id(1)

    @pl.when(i == 0)
    def _():
        acc_ref[...] = jnp.zeros_like(acc_ref)

    start_row = (c * tiles_per_slice + i) * tile_rows
    rows_here = valid_rows - start_row          # >= 1 by construction
    n_chunks = tile_rows // chunk_rows

    def accumulate(masked):
        def body(k, carry):
            s_o, s_pb, s_tp, s_bce = carry
            off = pl.multiple_of(k * chunk_rows, 8)
            o = o_ref[pl.ds(off, chunk_rows), :].astype(jnp.float32)
            t = t_ref[pl.ds(off, chunk_rows), :].astype(jnp.float32)
            if masked:
                # Zero out rows past the valid range; garbage rows from the
                # partially out-of-bounds DMA must be masked *before* the logs.
                rid = lax.broadcasted_iota(jnp.int32, (chunk_rows, LANES), 0) + off
                ok = rid < rows_here
                o = jnp.where(ok, o, 0.0)
                t = jnp.where(ok, t, 0.0)

            hit = t > THRESHOLD
            pb = jnp.where(hit, 1.0, 0.0)          # preds_binary
            tp = jnp.where(hit, o, 0.0)            # outputs * preds_binary
            # BCELoss(outputs, targets): -(t*log(o) + (1-t)*log(1-o)), logs clamped
            log_o = jnp.maximum(jnp.log(o), -100.0)
            log_1mo = jnp.maximum(jnp.log(1.0 - o), -100.0)
            bce = t * (log_1mo - log_o) - log_1mo

            def red(x):
                # (chunk_rows, LANES) -> (8, LANES): vreg-aligned reshape +
                # elementwise VALU adds only (no XLU cross-lane reduce here).
                return jnp.sum(x.reshape(chunk_rows // 8, 8, LANES), axis=0)

            return (s_o + red(o), s_pb + red(pb), s_tp + red(tp), s_bce + red(bce))

        z = jnp.zeros((8, LANES), jnp.float32)
        s_o, s_pb, s_tp, s_bce = lax.fori_loop(0, n_chunks, body, (z, z, z, z))
        acc_ref[0, 0] += s_o
        acc_ref[0, 1] += s_pb
        acc_ref[0, 2] += s_tp
        acc_ref[0, 3] += s_bce

    if needs_mask:
        # Only the global last tile can be partial; keep the hot path mask-free.
        @pl.when(rows_here >= tile_rows)
        def _():
            accumulate(False)

        @pl.when(rows_here < tile_rows)
        def _():
            accumulate(True)
    else:
        accumulate(False)


def dice_multilabel_loss(outputs, targets):
    """outputs, targets: float arrays of identical shape; outputs in (0,1) (BCELoss).

    Inputs outside (0,1) produce NaN through log(), matching torch.nn.BCELoss.
    """
    dtype = jnp.promote_types(outputs.dtype, targets.dtype)
    o = jnp.reshape(outputs, (-1,)).astype(dtype)   # no-op casts in the common case
    t = jnp.reshape(targets, (-1,)).astype(dtype)
    n = o.shape[0]

    # Zero-copy path when n is a multiple of 128 (typical NN tensors): the flat
    # array reshapes directly into a lane-dense (rows, 128) slab.
    # TODO(synk): the rare n % 128 != 0 path still pads (<128 elems) = 1 extra pass.
    rem = n % LANES
    if rem:
        o = jnp.pad(o, (0, LANES - rem))
        t = jnp.pad(t, (0, LANES - rem))
    rows = o.shape[0] // LANES
    o2 = o.reshape(rows, LANES)
    t2 = t.reshape(rows, LANES)

    itemsize = jnp.dtype(dtype).itemsize
    sub = {4: 8, 2: 16, 1: 32}.get(itemsize, 8)          # min sublane multiple
    max_tile_rows = max(sub, MAX_TILE_BYTES // (LANES * itemsize))

    def plan(num_slices):
        rps = _cdiv(rows, num_slices)
        n_tiles = _cdiv(rps, max_tile_rows)
        tr = _round_up(_cdiv(rps, n_tiles), sub)         # balanced tiles
        cr = min(CHUNK_ROWS, tr)
        tr = _round_up(tr, cr)
        return tr, n_tiles, cr

    num_slices = NUM_SLICES
    tile_rows, tiles_per_slice, chunk_rows = plan(num_slices)
    # Every grid step must own >= 1 valid row (no fully out-of-bounds tiles).
    if num_slices > 1 and (num_slices * tiles_per_slice - 1) * tile_rows >= rows:
        num_slices = 1
        tile_rows, tiles_per_slice, chunk_rows = plan(1)
    if num_slices == 1:
        while tiles_per_slice > 1 and (tiles_per_slice - 1) * tile_rows >= rows:
            tiles_per_slice -= 1

    needs_mask = num_slices * tiles_per_slice * tile_rows > rows

    in_spec = pl.BlockSpec((tile_rows, LANES),
                           lambda c, i: (c * tiles_per_slice + i, 0))
    out_spec = pl.BlockSpec((1, 4, 8, LANES), lambda c, i: (c, 0, 0, 0))

    kernel = functools.partial(
        _dice_bce_partials_kernel,
        tile_rows=tile_rows, chunk_rows=chunk_rows,
        tiles_per_slice=tiles_per_slice, valid_rows=rows,
        needs_mask=needs_mask)

    n_elems = rows * LANES
    cost = pl.CostEstimate(
        flops=13 * n_elems,
        transcendentals=2 * n_elems,
        bytes_accessed=2 * n_elems * itemsize + num_slices * 4 * 8 * LANES * 4)

    partials = pl.pallas_call(
        kernel,
        out_shape=jax.ShapeDtypeStruct((num_slices, 4, 8, LANES), jnp.float32),
        grid_spec=pltpu.PrefetchScalarGridSpec(
            num_scalar_prefetch=0,
            grid=(num_slices, tiles_per_slice),
            in_specs=[in_spec, in_spec],
            out_specs=out_spec,
        ),
        compiler_params=pltpu.CompilerParams(
            dimension_semantics=("parallel", "arbitrary")),
        cost_estimate=cost,
    )(o2, t2)

    sums = jnp.sum(partials, axis=(0, 2, 3))            # (4,)
    s_out, s_pb, s_tp, s_bce = sums[0], sums[1], sums[2], sums[3]

    smooth = 1.0
    score = (2.0 * s_tp + smooth) / (s_out + s_pb + smooth)
    dice = 1.0 - score
    bce_mean = s_bce / float(n)
    return 0.5 * (bce_mean + dice)


def _reference(outputs, targets):
    smooth = 1.0
    o = jnp.reshape(outputs, (-1,)).astype(jnp.float32)
    t = jnp.reshape(targets, (-1,)).astype(jnp.float32)
    pb = jnp.where(t > THRESHOLD, 1.0, 0.0)
    tp = jnp.sum(o * pb)
    score = (2.0 * tp + smooth) / (jnp.sum(o) + jnp.sum(pb) + smooth)
    dice = 1.0 - score
    bce = jnp.mean(-(t * jnp.maximum(jnp.log(o), -100.0)
                     + (1.0 - t) * jnp.maximum(jnp.log(1.0 - o), -100.0)))
    return 0.5 * (bce + dice)


if __name__ == "__main__":
    key = jax.random.PRNGKey(0)
    k1, k2, k3, k4 = jax.random.split(key, 4)

    # NCHW probabilities, as BCELoss requires outputs in (0, 1).
    outputs = jax.nn.sigmoid(jax.random.normal(k1, (2, 4, 16, 16), jnp.float32))
    targets = jax.random.uniform(k2, (2, 4, 16, 16), jnp.float32)
    loss = dice_multilabel_loss(outputs, targets)
    jax.block_until_ready(loss)
    ref = _reference(outputs, targets)
    assert jnp.allclose(loss, ref, atol=1e-5, rtol=1e-5), (loss, ref)

    # Ragged shape: exercises the lane-pad fallback and the masked tail tile.
    outputs2 = jax.nn.sigmoid(jax.random.normal(k3, (3, 5, 7, 13), jnp.float32))
    targets2 = jax.random.uniform(k4, (3, 5, 7, 13), jnp.float32)
    loss2 = dice_multilabel_loss(outputs2, targets2)
    jax.block_until_ready(loss2)
    ref2 = _reference(outputs2, targets2)
    assert jnp.allclose(loss2, ref2, atol=1e-5, rtol=1e-5), (loss2, ref2)

    print("KERNEL_OK")
</pallas_src>

<mosaic_0001>
module attributes {stable_mosaic.version = 11 : i64} {
  func.func @_dice_bce_partials_kernel(%arg0: i32, %arg1: i32, %arg2: memref<8x128xf32, #tpu.memory_space<vmem>>, %arg3: memref<8x128xf32, #tpu.memory_space<vmem>>, %arg4: memref<1x4x8x128xf32, #tpu.memory_space<vmem>>) attributes {dimension_semantics = [#tpu.dimension_semantics<parallel>, #tpu.dimension_semantics<arbitrary>], iteration_bounds = array<i64: 2, 1>, scalar_prefetch = 0 : i64, scratch_operands = 0 : i64, tpu.core_type = #tpu.core_type<tc>, window_params = [{transform_indices = @transform_0, window_bounds = array<i64: 8, 128>}, {transform_indices = @transform_1, window_bounds = array<i64: 8, 128>}, {transform_indices = @transform_2, window_bounds = array<i64: 1, 4, 8, 128>}]} {
    %c0_i32 = arith.constant 0 : i32
    %0 = arith.cmpi eq, %arg1, %c0_i32 : i32
    %1 = arith.extui %0 : i1 to i32
    %c0_i32_0 = arith.constant 0 : i32
    %2 = arith.cmpi ne, %1, %c0_i32_0 : i32
    scf.if %2 {
      %cst_43 = arith.constant 0.000000e+00 : f32
      %64 = vector.broadcast %cst_43 : f32 to vector<1x4x8x128xf32>
      %c0_44 = arith.constant 0 : index
      %c0_45 = arith.constant 0 : index
      %c0_46 = arith.constant 0 : index
      %c0_47 = arith.constant 0 : index
      %65 = vector.load %arg4[%c0_44, %c0_45, %c0_46, %c0_47] : memref<1x4x8x128xf32, #tpu.memory_space<vmem>>, vector<1x4x8x128xf32>
      tpu.vector_store %arg4[%c0_44, %c0_45, %c0_46, %c0_47], %64 {strides = array<i32>} : memref<1x4x8x128xf32, #tpu.memory_space<vmem>>, vector<1x4x8x128xf32>,
    } else {
    }
    %cst = arith.constant 0.000000e+00 : f32
    %3 = vector.broadcast %cst : f32 to vector<8x128xf32>
    %c0_i32_1 = arith.constant 0 : i32
    %c8_i32 = arith.constant 8 : i32
    %4 = arith.muli %c0_i32_1, %c8_i32 : i32
    %5 = tpu.assume_multiple %4, 8 : i32
    %6 = arith.index_cast %5 : i32 to index
    %c0 = arith.constant 0 : index
    %7 = vector.load %arg2[%6, %c0] : memref<8x128xf32, #tpu.memory_space<vmem>>, vector<8x128xf32>
    %8 = arith.index_cast %5 : i32 to index
    %c0_2 = arith.constant 0 : index
    %9 = vector.load %arg3[%8, %c0_2] : memref<8x128xf32, #tpu.memory_space<vmem>>, vector<8x128xf32>
    %cst_3 = arith.constant 5.000000e-01 : f32
    %10 = vector.broadcast %cst_3 : f32 to vector<8x128xf32>
    %11 = arith.cmpf ogt, %9, %10 : vector<8x128xf32>
    %cst_4 = arith.constant 1.000000e+00 : f32
    %cst_5 = arith.constant 0.000000e+00 : f32
    %12 = vector.broadcast %cst_4 : f32 to vector<8x128xf32>
    %13 = vector.broadcast %cst_5 : f32 to vector<8x128xf32>
    %14 = arith.select %11, %12, %13 : vector<8x128xi1>, vector<8x128xf32>
    %cst_6 = arith.constant 0.000000e+00 : f32
    %15 = vector.broadcast %cst_6 : f32 to vector<8x128xf32>
    %16 = arith.select %11, %7, %15 : vector<8x128xi1>, vector<8x128xf32>
    %17 = math.log %7 : vector<8x128xf32>
    %cst_7 = arith.constant -1.000000e+02 : f32
    %18 = vector.broadcast %cst_7 : f32 to vector<8x128xf32>
    %19 = arith.maximumf %17, %18 : vector<8x128xf32>
    %cst_8 = arith.constant 1.000000e+00 : f32
    %20 = vector.broadcast %cst_8 : f32 to vector<8x128xf32>
    %21 = arith.subf %20, %7 : vector<8x128xf32>
    %22 = math.log %21 : vector<8x128xf32>
    %cst_9 = arith.constant -1.000000e+02 : f32
    %23 = vector.broadcast %cst_9 : f32 to vector<8x128xf32>
    %24 = arith.maximumf %22, %23 : vector<8x128xf32>
    %25 = arith.subf %24, %19 : vector<8x128xf32>
    %26 = arith.mulf %9, %25 : vector<8x128xf32>
    %27 = arith.subf %26, %24 : vector<8x128xf32>
    %28 = vector.shape_cast %7 : vector<8x128xf32> to vector<1x8x128xf32>
    %cst_10 = arith.constant dense<0.000000e+00> : vector<8x128xf32>
    %29 = vector.multi_reduction <add>, %28, %cst_10 [0] : vector<1x8x128xf32> to vector<8x128xf32>
    %30 = arith.addf %3, %29 : vector<8x128xf32>
    %31 = vector.shape_cast %14 : vector<8x128xf32> to vector<1x8x128xf32>
    %cst_11 = arith.constant dense<0.000000e+00> : vector<8x128xf32>
    %32 = vector.multi_reduction <add>, %31, %cst_11 [0] : vector<1x8x128xf32> to vector<8x128xf32>
    %33 = arith.addf %3, %32 : vector<8x128xf32>
    %34 = vector.shape_cast %16 : vector<8x128xf32> to vector<1x8x128xf32>
    %cst_12 = arith.constant dense<0.000000e+00> : vector<8x128xf32>
    %35 = vector.multi_reduction <add>, %34, %cst_12 [0] : vector<1x8x128xf32> to vector<8x128xf32>
    %36 = arith.addf %3, %35 : vector<8x128xf32>
    %37 = vector.shape_cast %27 : vector<8x128xf32> to vector<1x8x128xf32>
    %cst_13 = arith.constant dense<0.000000e+00> : vector<8x128xf32>
    %38 = vector.multi_reduction <add>, %37, %cst_13 [0] : vector<1x8x128xf32> to vector<8x128xf32>
    %39 = arith.addf %3, %38 : vector<8x128xf32>
    %c1_i32 = arith.constant 1 : i32
    %c0_14 = arith.constant 0 : index
    %c0_15 = arith.constant 0 : index
    %c0_16 = arith.constant 0 : index
    %c0_17 = arith.constant 0 : index
    %40 = vector.load %arg4[%c0_14, %c0_15, %c0_16, %c0_17] : memref<1x4x8x128xf32, #tpu.memory_space<vmem>>, vector<1x1x8x128xf32>
    %41 = vector.shape_cast %40 : vector<1x1x8x128xf32> to vector<8x128xf32>
    %42 = arith.addf %41, %30 : vector<8x128xf32>
    %c0_18 = arith.constant 0 : index
    %c0_19 = arith.constant 0 : index
    %c0_20 = arith.constant 0 : index
    %c0_21 = arith.constant 0 : index
    %43 = vector.load %arg4[%c0_18, %c0_19, %c0_20, %c0_21] : memref<1x4x8x128xf32, #tpu.memory_space<vmem>>, vector<1x1x8x128xf32>
    %44 = vector.shape_cast %43 : vector<1x1x8x128xf32> to vector<8x128xf32>
    %45 = vector.shape_cast %42 : vector<8x128xf32> to vector<1x1x8x128xf32>
    tpu.vector_store %arg4[%c0_18, %c0_19, %c0_20, %c0_21], %45 {strides = array<i32>} : memref<1x4x8x128xf32, #tpu.memory_space<vmem>>, vector<1x1x8x128xf32>,
    %c0_22 = arith.constant 0 : index
    %c1 = arith.constant 1 : index
    %c0_23 = arith.constant 0 : index
    %c0_24 = arith.constant 0 : index
    %46 = vector.load %arg4[%c0_22, %c1, %c0_23, %c0_24] : memref<1x4x8x128xf32, #tpu.memory_space<vmem>>, vector<1x1x8x128xf32>
    %47 = vector.shape_cast %46 : vector<1x1x8x128xf32> to vector<8x128xf32>
    %48 = arith.addf %47, %33 : vector<8x128xf32>
    %c0_25 = arith.constant 0 : index
    %c1_26 = arith.constant 1 : index
    %c0_27 = arith.constant 0 : index
    %c0_28 = arith.constant 0 : index
    %49 = vector.load %arg4[%c0_25, %c1_26, %c0_27, %c0_28] : memref<1x4x8x128xf32, #tpu.memory_space<vmem>>, vector<1x1x8x128xf32>
    %50 = vector.shape_cast %49 : vector<1x1x8x128xf32> to vector<8x128xf32>
    %51 = vector.shape_cast %48 : vector<8x128xf32> to vector<1x1x8x128xf32>
    tpu.vector_store %arg4[%c0_25, %c1_26, %c0_27, %c0_28], %51 {strides = array<i32>} : memref<1x4x8x128xf32, #tpu.memory_space<vmem>>, vector<1x1x8x128xf32>,
    %c0_29 = arith.constant 0 : index
    %c2 = arith.constant 2 : index
    %c0_30 = arith.constant 0 : index
    %c0_31 = arith.constant 0 : index
    %52 = vector.load %arg4[%c0_29, %c2, %c0_30, %c0_31] : memref<1x4x8x128xf32, #tpu.memory_space<vmem>>, vector<1x1x8x128xf32>
    %53 = vector.shape_cast %52 : vector<1x1x8x128xf32> to vector<8x128xf32>
    %54 = arith.addf %53, %36 : vector<8x128xf32>
    %c0_32 = arith.constant 0 : index
    %c2_33 = arith.constant 2 : index
    %c0_34 = arith.constant 0 : index
    %c0_35 = arith.constant 0 : index
    %55 = vector.load %arg4[%c0_32, %c2_33, %c0_34, %c0_35] : memref<1x4x8x128xf32, #tpu.memory_space<vmem>>, vector<1x1x8x128xf32>
    %56 = vector.shape_cast %55 : vector<1x1x8x128xf32> to vector<8x128xf32>
    %57 = vector.shape_cast %54 : vector<8x128xf32> to vector<1x1x8x128xf32>
    tpu.vector_store %arg4[%c0_32, %c2_33, %c0_34, %c0_35], %57 {strides = array<i32>} : memref<1x4x8x128xf32, #tpu.memory_space<vmem>>, vector<1x1x8x128xf32>,
    %c0_36 = arith.constant 0 : index
    %c3 = arith.constant 3 : index
    %c0_37 = arith.constant 0 : index
    %c0_38 = arith.constant 0 : index
    %58 = vector.load %arg4[%c0_36, %c3, %c0_37, %c0_38] : memref<1x4x8x128xf32, #tpu.memory_space<vmem>>, vector<1x1x8x128xf32>
    %59 = vector.shape_cast %58 : vector<1x1x8x128xf32> to vector<8x128xf32>
    %60 = arith.addf %59, %39 : vector<8x128xf32>
    %c0_39 = arith.constant 0 : index
    %c3_40 = arith.constant 3 : index
    %c0_41 = arith.constant 0 : index
    %c0_42 = arith.constant 0 : index
    %61 = vector.load %arg4[%c0_39, %c3_40, %c0_41, %c0_42] : memref<1x4x8x128xf32, #tpu.memory_space<vmem>>, vector<1x1x8x128xf32>
    %62 = vector.shape_cast %61 : vector<1x1x8x128xf32> to vector<8x128xf32>
    %63 = vector.shape_cast %60 : vector<8x128xf32> to vector<1x1x8x128xf32>
    tpu.vector_store %arg4[%c0_39, %c3_40, %c0_41, %c0_42], %63 {strides = array<i32>} : memref<1x4x8x128xf32, #tpu.memory_space<vmem>>, vector<1x1x8x128xf32>,
    return
  }
  func.func @transform_0(%arg0: i32, %arg1: i32) -> (i32, i32) {
    %c1_i32 = arith.constant 1 : i32
    %0 = arith.muli %arg0, %c1_i32 : i32
    %1 = arith.addi %0, %arg1 : i32
    %c0_i32 = arith.constant 0 : i32
    %c0_i32_0 = arith.constant 0 : i32
    return %1, %c0_i32 : i32, i32
  }
  func.func @transform_1(%arg0: i32, %arg1: i32) -> (i32, i32) {
    %c1_i32 = arith.constant 1 : i32
    %0 = arith.muli %arg0, %c1_i32 : i32
    %1 = arith.addi %0, %arg1 : i32
    %c0_i32 = arith.constant 0 : i32
    %c0_i32_0 = arith.constant 0 : i32
    return %1, %c0_i32 : i32, i32
  }
  func.func @transform_2(%arg0: i32, %arg1: i32) -> (i32, i32, i32, i32) {
    %c0_i32 = arith.constant 0 : i32
    %c0_i32_0 = arith.constant 0 : i32
    %c0_i32_1 = arith.constant 0 : i32
    %c0_i32_2 = arith.constant 0 : i32
    return %arg0, %c0_i32, %c0_i32_0, %c0_i32_1 : i32, i32, i32, i32
  }
}

</mosaic_0001>

<bundles_post_ra>
// kernel: tpu_custom_call.1
= control target key start
LH: loop header
LB: loop body
LE: loop exit
PB: predicated region body
PF: predicated region fallthrough
CT: control target
= control target key end

     0   :  { %7 = vsyncpa [#allocation3], 0  ;;  %s872_s0 = inlined_call_operand.hbm [shape: f32[16,128], index: 0, kind: input, shape index: {}]   ;;  %s873_s1 = inlined_call_operand.hbm [shape: f32[16,128], index: 1, kind: input, shape index: {}]   ;;  %s874_s2 = inlined_call_operand.hbm [shape: f32[2,4,8,128], index: 2, kind: output, shape index: {}]  }
   0x1   :  { %9 = vsyncpa [#allocation3 + $0x1], 0 }
   0x2   :  { %10 = vsyncpa [#allocation6], 0 }
   0x3   :  { %12 = vsyncpa [#allocation6 + $0x1], 0 }
   0x4   :  { %13 = vsyncpa [#allocation4], 0 }
   0x5   :  { %15 = vsyncpa [#allocation4 + $0x1], 0  ;;  %s649_s9 = smov 0   ;;  %s651_s10 = smov 0  }
   0x6   :  { %s653_s11 = smov 0   ;;  %s655_s12 = smov 0  }
   0x7   :  { %s657_s13 = smov 0   ;;  %s659_s14 = smov 0  }
   0x8 LB: > { %s382_s15 = sadd.s32 4294967295, %s626_s14   ;;  %s383_s16 = sadd.s32 4294967294, %s626_s14   ;;  %s626_s14 = sphi %s659_s14, %s21_s14   ;;  %s622_s13 = sphi %s657_s13, %s894_s13   ;;  %s618_s12 = sphi %s655_s12, %s893_s12   ;;  %s614_s11 = sphi %s653_s11, %s892_s11   ;;  %s610_s10 = sphi %s651_s10, %s891_s10   ;;  %s606_s9 = sphi %s649_s9, %s890_s9  }
   0x9   : > { %s33_s17 = sadd.s32 1, %s622_s13  ;;  %s42_s18 = sadd.s32 1, %s614_s11 }
   0xa   : > { %p35_p0 = scmp.ge.s32.totalorder %s33_s17, 2  ;;  %p49_p1 = scmp.ne.s32.totalorder %s614_s11, %s610_s10 }
   0xb   : > { %p50_p2 = scmp.eq.s32.totalorder %s626_s14, 0  ;;  %p55_p3 = scmp.ne.s32.totalorder %s610_s10, %s606_s9 }
   0xc   : > { %s896_s17 = smov (%p35_p0, %s33_s17), 0  ;;  %p56_p5 = scmp.eq.s32.totalorder %s382_s15, 0 }
   0xd   : > { %p690_p4 = por %p50_p2, %p49_p1  ;;  %s39_s20 = ssub.s32 %s622_s13, %s896_s17 }
   0xe   : > { %p107_p6 = scmp.eq.s32.totalorder %s382_s15, 1  ;;  %p40_p7 = scmp.eq.s32.totalorder %s39_s20, 0 }
   0xf   : > { %p696_p8 = por %p56_p5, %p55_p3  ;;  %p113_p10 = scmp.eq.s32.totalorder %s383_s16, 1 }
  0x10   : > { %p700_p9 = por %p107_p6, %p49_p1  ;;  %p423_p13 = scmp.lt.s32.totalorder %s626_s14, 2 }
  0x11   : > { %s878_s21 = scalar_select %p696_p8, 1, 0 }
  0x12   : > { %s879_s22 = scalar_select %p700_p9, 1, 0 }
  0x13   : > { %s705_s23 = scalar_select %p40_p7, %s614_s11, %s42_s18  }
  0x14   : > { %p707_p11 = por %p113_p10, %p55_p3  ;;  %s714_s25 = sand.u32 1, %s614_s11  }
  0x15   : > { %s386_s26 = sshll.u32 %s714_s25, 3  ;;  %s387_s27 = sshll.u32 %s622_s13, 7 }
  0x16   : > { %s880_s24 = scalar_select %p707_p11, 1, 0 }
  0x17   : > { %s723_s30 = scalar_lea.hbm %s872_s0, %s387_s27  ;;  %s137_s3 = scalar_lea.vmem [#allocation2], %s386_s26 }
  0x18   : > { %s145_s4 = sshll.u32 %s137_s3, 4  ;;  %p731_p0 = pnand %p423_p13, %p690_p4  ;;  %s727_s4 = int_to_ptr.vmem [resolvable:$true] %s145_s4 }
  0x19   : > { %s134_s6 = scalar_lea.sflag [#allocation3], %s714_s25  ;;  %s480_s7 = scalar_lea.hbm %s723_s30, 128 }
  0x1a   : > { %p481_p3 = scmp.ne.s32.totalorder %s723_s30, %s480_s7  ;;  %p482_p5 = pneg %p731_p0 }
  0x1b   : > { %s485_s16 = scalar_lea.hbm %s872_s0, 256  ;;  %p486_p4 = scmp.lt.u32.totalorder %s723_s30, %s872_s0 }
  0x1c   : > { %p483_p6 = pnand %p482_p5, %p481_p3  ;;  %p487_p10 = scmp.lt.u32.totalorder %s485_s16, %s480_s7 }
  0x1d   : > { %p489_p12 = scmp.lt.u32.totalorder %s480_s7, %s723_s30 }
  0x1e   : > { %p484_p7 = pneg %p483_p6  ;;  %p488_p13 = por %p487_p10, %p486_p4 }
  0x20   : > { %p490_p1 = por %p489_p12, %p488_p13 }
  0x22   : > { %p491_p2 = pnand %p490_p1, %p484_p7 }
  0x24   : > { %494 = shalt.err (!%p491_p2)
}
  0x25   : > { %s495_s20 = scalar_lea.vmem %s727_s4, 128  ;;  %s628_s28 = smov [#allocation2]  }
  0x26   : > { %p496_p3 = scmp.ne.s32.totalorder %s727_s4, %s495_s20  ;;  %s500_s29 = sshll.u32 %s628_s28, 4  ;;  %s501_s29 = int_to_ptr.vmem [resolvable:$false] %s500_s29 }
  0x27   : > { %s502_s3 = scalar_lea.vmem %s501_s29, 256  ;;  %p503_p9 = scmp.lt.s32.totalorder %s727_s4, %s501_s29 }
  0x28   : > { %p498_p6 = pnand %p496_p3, %p482_p5  ;;  %p504_p4 = scmp.lt.s32.totalorder %s502_s3, %s495_s20 }
  0x2a   : > { %p499_p11 = pneg %p498_p6  ;;  %p505_p10 = por %p504_p4, %p503_p9 }
  0x2c   : > { %p506_p12 = pnand %p505_p10, %p499_p11 }
  0x2e   : > { %509 = shalt.err (!%p506_p12)
}
  0x2f   : > { %415 = dma.hbm_to_vmem [thread:$0]  (!%p731_p0), %s723_s30, 128, %s727_s4, %s134_s6  }
  0x30   : > { %p882_p1 = scmp.lt.s32.totalorder %s626_s14, 3  ;;  %p883_p2 = scmp.ge.s32.totalorder %s626_s14, 1 }
  0x31   : > { %s776_s16 = scalar_lea.hbm %s873_s1, %s387_s27  ;;  %s156_s18 = scalar_lea.vmem [#allocation5], %s386_s26 }
  0x32   : > { %p767_p7 = pnand %p883_p2, %p882_p1  ;;  %s164_s19 = sshll.u32 %s156_s18, 4  ;;  %s165_s19 = int_to_ptr.vmem [resolvable:$true] %s164_s19 }
  0x33   : > { %s153_s30 = scalar_lea.sflag [#allocation6], %s714_s25  ;;  %s510_s4 = scalar_lea.hbm %s776_s16, 128 }
  0x34   : > { %s884_s7 = scalar_select %p767_p7, 1, 0 }
  0x35   : > { %p511_p9 = scmp.ne.s32.totalorder %s776_s16, %s510_s4  ;;  %s515_s27 = scalar_lea.hbm %s873_s1, 256 }
  0x36   : > { %p516_p3 = scmp.lt.u32.totalorder %s776_s16, %s873_s1  ;;  %p517_p6 = scmp.lt.u32.totalorder %s515_s27, %s510_s4 }
  0x37   : > { %p513_p11 = pnand %p511_p9, %p482_p5  ;;  %p519_p10 = scmp.lt.u32.totalorder %s510_s4, %s776_s16 }
  0x38   : > { %p518_p4 = por %p517_p6, %p516_p3 }
  0x39   : > { %p514_p13 = pneg %p513_p11 }
  0x3a   : > { %p520_p12 = por %p519_p10, %p518_p4 }
  0x3c   : > { %p521_p1 = pnand %p520_p12, %p514_p13 }
  0x3e   : > { %524 = shalt.err (!%p521_p1)
}
  0x3f   : > { %s525_s25 = scalar_lea.vmem %s165_s19, 128  ;;  %s629_s26 = smov [#allocation5]  }
  0x40   : > { %p526_p2 = scmp.ne.s32.totalorder %s165_s19, %s525_s25  ;;  %s530_s3 = sshll.u32 %s629_s26, 4  ;;  %s531_s3 = int_to_ptr.vmem [resolvable:$false] %s530_s3 }
  0x41   : > { %s532_s8 = scalar_lea.vmem %s531_s3, 256  ;;  %p533_p8 = scmp.lt.s32.totalorder %s165_s19, %s531_s3 }
  0x42   : > { %p528_p9 = pnand %p526_p2, %p482_p5  ;;  %p534_p7 = scmp.lt.s32.totalorder %s532_s8, %s525_s25 }
  0x44   : > { %p529_p11 = pneg %p528_p9  ;;  %p535_p3 = por %p534_p7, %p533_p8 }
  0x46   : > { %p536_p6 = pnand %p535_p3, %p529_p11 }
  0x48   : > { %539 = shalt.err (!%p536_p6)
}
  0x49   : > { %418 = dma.hbm_to_vmem [thread:$0]  (!%p731_p0), %s776_s16, 128, %s165_s19, %s153_s30  }
  0x4a   : > { %p885_p13 = scmp.ne.s32.totalorder %s884_s7, 0 }
  0x4b   : > { %s803_s15 = sand.u32 (!%p885_p13), 1, %s610_s10   ;;  %p886_p5 = scmp.ne.s32.totalorder (!%p885_p13), %s878_s21, 0 }
  0x4c   : > { %173 = sbr.rel (%p885_p13) target bundleno = 125 (0x7d), region = 28  ;;  %s391_s18 = sshll.u32 (!%p885_p13), %s803_s15, 3 }
  0x4d   : > { %s176_s4 = scalar_lea.sflag (!%p885_p13), [#allocation3], %s803_s15  ;;  %s179_s6 = scalar_lea.vmem (!%p885_p13), [#allocation2], %s391_s18 }
  0x53   : > { %593 = dma.done.wait (%p886_p5), %s176_s4, 128  }
  0x54   : > { %595 = vsyncadd (%p886_p5), %s176_s4, 4294967168  ;;  %s185_s5 = scalar_lea.sflag [#allocation6], %s803_s15  ;;  %s188_s16 = scalar_lea.vmem [#allocation5], %s391_s18 }
  0x55   : > { %597 = dma.done.wait (%p886_p5), %s185_s5, 128  }
  0x56   : > { %599 = vsyncadd (%p886_p5), %s185_s5, 4294967168  ;;  %s393_s7 = sshll.u32 %s803_s15, 5  ;;  %v224_v0 = vld [vmem:[%s179_s6] sm:$0xff]  ;;  %v225_v1 = vld [vmem:[%s188_s16] sm:$0xff]  ;;  %v630_v3 = vmov 0.0   ;;  %s405_s21 = sshll.u32 %s618_s12, 9 }
  0x57   : > { %476 = vlog2.f32 %v224_v0  ;;  %vm226_vm0 = vcmp.gt.f32.partialorder %v225_v1, 0.5  ;;  %v232_v2 = vsub.f32 1.0, %v224_v0  ;;  %s213_s19 = scalar_lea.vmem [#allocation7], %s393_s7  ;;  %s821_s28 = scalar_lea.hbm %s874_s2, %s405_s21 }
  0x58   : > { %v227_v4 = vsel %vm226_vm0, 1.0, %v630_v3  ;;  %v228_v5 = vsel %vm226_vm0, %v224_v0, 0.0  ;;  %249 = vst [vmem:[%s213_s19] sm:$0xff] %v224_v0  ;;  %s276_s30 = sshll.u32 %s213_s19, 4  ;;  %s263_s29 = scalar_lea.sflag [#allocation4], %s803_s15  ;;  %s823_s30 = int_to_ptr.vmem [resolvable:$true] %s276_s30 }
  0x59   : > { %478 = vlog2.f32 %v232_v2  ;;  %395 = vst [vmem:[%s213_s19 + $0x8] sm:$0xff] %v227_v4  ;;  %397 = vst [vmem:[%s213_s19 + $0x10] sm:$0xff] %v228_v5  ;;  %s540_s25 = scalar_lea.vmem %s823_s30, 512  ;;  %p887_p0 = scmp.ne.s32.totalorder %s879_s22, 0 }
  0x5a   : > { %p541_p8 = scmp.ne.s32.totalorder %s823_s30, %s540_s25  ;;  %s631_s12 = smov [#allocation7]  }
  0x5b   : > { %s544_s26 = sshll.u32 %s631_s12, 4  ;;  %s545_s26 = int_to_ptr.vmem [resolvable:$false] %s544_s26 }
  0x5c   : > { %p542_p7 = pnand %p541_p8, %p887_p0  ;;  %s546_s3 = scalar_lea.vmem %s545_s26, 1024 }
  0x5d   : > { %p547_p10 = scmp.lt.s32.totalorder %s823_s30, %s545_s26  ;;  %p548_p12 = scmp.lt.s32.totalorder %s546_s3, %s540_s25 }
  0x5e   : > { %p543_p4 = pneg %p542_p7 }
  0x5f   : > { %p549_p1 = por %p548_p12, %p547_p10 }
  0x61   : > { %v477_v6 = vpop.eup %476  ;;  %p550_p2 = pnand %p549_p1, %p543_p4 }
  0x62   : > { %v230_v7 = vmul.f32 0.6931472, %v477_v6 }
  0x63   : > { %v479_v8 = vpop.eup %478 }
  0x64   : > { %v231_v9 = vmax.f32 %v230_v7, -100.0  ;;  %v234_v10 = vmul.f32 0.6931472, %v479_v8 }
  0x66   : > { %v235_v11 = vmax.f32 %v234_v10, -100.0 }
  0x68   : > { %v236_v12 = vsub.f32 %v235_v11, %v231_v9 }
  0x6a   : > { %v237_v13 = vmul.f32 %v236_v12, %v225_v1 }
  0x6c   : > { %v238_v14 = vsub.f32 %v237_v13, %v235_v11 }
  0x6e   : > { %399 = vst [vmem:[%s213_s19 + $0x18] sm:$0xff] %v238_v14 }
  0x6f   : > { %553 = shalt.err (!%p550_p2)
}
  0x70   : > { %s554_s8 = scalar_lea.hbm %s821_s28, 512  ;;  %s558_s6 = scalar_lea.hbm %s874_s2, 1024 }
  0x71   : > { %p555_p9 = scmp.ne.s32.totalorder %s821_s28, %s554_s8  ;;  %p559_p6 = scmp.lt.u32.totalorder %s821_s28, %s874_s2 }
  0x72   : > { %p560_p13 = scmp.lt.u32.totalorder %s558_s6, %s554_s8  ;;  %p562_p8 = scmp.lt.u32.totalorder %s554_s8, %s821_s28 }
  0x73   : > { %p556_p11 = pnand %p555_p9, %p887_p0 }
  0x74   : > { %p561_p5 = por %p560_p13, %p559_p6 }
  0x75   : > { %p557_p3 = pneg %p556_p11 }
  0x76   : > { %p563_p7 = por %p562_p8, %p561_p5 }
  0x78   : > { %p564_p4 = pnand %p563_p7, %p557_p3 }
  0x7a   : > { %567 = shalt.err (!%p564_p4)
}
  0x7b   : > { %s632_s7 = smov 128   ;;  %s633_s19 = smov 8  }
  0x7c   : > { %410 = dma.vmem_to_hbm [thread:$0]  (%p887_p0), %s823_s30, 512, %s821_s28, %s263_s29, %s632_s7, %s632_s7, %s633_s19  }
  0x7d PF: > { %s291_s21 = sand.u32 1, %s606_s9   ;;  %p888_p10 = scmp.ne.s32.totalorder %s880_s24, 0 }
  0x7e   : > { %p889_p12 = scmp.ge.s32.totalorder %s626_s14, 2  ;;  %s292_s20 = scalar_lea.sflag [#allocation4], %s291_s21 }
  0x80   : > { %p420_p1 = pnand %p889_p12, %p888_p10 }
  0x82   : > { %601 = dma.done.wait (!%p420_p1), %s292_s20, 512  }
  0x83   : > { %603 = vsyncadd (!%p420_p1), %s292_s20, 4294966784  ;;  %s21_s14 = sadd.s32 1, %s626_s14   ;;  %s890_s9 = smov %s610_s10 }
  0x84   : > { %p18_p2 = scmp.ge.s32.totalorder %s21_s14, 4   ;;  %s891_s10 = smov %s614_s11 }
  0x85   : > { %s892_s11 = smov %s705_s23  ;;  %s893_s12 = smov %s622_s13 }
  0x86   : > { %s894_s13 = smov %s896_s17  ;;  %20 = sbr.rel (!%p18_p2) target bundleno = 8 (0x8), region = 93 }
  0x8d   :  { %297 = vsyncpa [#allocation3], 1 }
  0x8e   :  { %299 = vsyncpa [#allocation3 + $0x1], 1 }
  0x8f   :  { %300 = vsyncpa [#allocation6], 1 }
  0x90   :  { %302 = vsyncpa [#allocation6 + $0x1], 1 }
  0x91   :  { %303 = vsyncpa [#allocation4], 1 }
  0x92   :  { %305 = vsyncpa [#allocation4 + $0x1], 1 }

</bundles_post_ra>
